<compile_context>
chip_gen: v5e
topology: v5e:2x2
jax: 0.10.0
libtpu: 0.0.40
codegen_flags: <defaults>
</compile_context>

<pallas_src>
import functools

import jax
import jax.numpy as jnp
from jax.experimental import pallas as pl
from jax.experimental.pallas import tpu as pltpu


def _zero_control_kernel(ada_ref, h_ref, wl_ref, bl_ref, o_ref):
    # ada_ref: (1, 2C)  per-batch row: [shift | 1+scale] (precomputed in wrapper)
    # h_ref:   (TN, C)  token tile (batch dim squeezed by BlockSpec)
    # wl_ref:  (C, C)   zero_linear weight, (in, out) layout, whole array in VMEM
    # bl_ref:  (1, C)   zero_linear bias, whole array in VMEM
    # o_ref:   (TN, C)
    c = o_ref.shape[-1]
    ada = ada_ref[...].astype(jnp.float32)
    shift = ada[:, :c]          # (1, C)
    scale1 = ada[:, c:]         # (1, C) == 1 + scale (hoisted in wrapper)

    h = h_ref[...].astype(jnp.float32)

    # modulate on the VPU in f32 (broadcast (1, C) rows over TN token rows)
    mod = h * scale1 + shift

    # zero_linear on the MXU: operands in the weight dtype, accumulate in f32.
    out = jnp.dot(mod.astype(wl_ref.dtype), wl_ref[...],
                  preferred_element_type=jnp.float32)
    out = out + bl_ref[...].astype(jnp.float32)
    o_ref[...] = out.astype(o_ref.dtype)


def prepare_params(w_ada, b_ada, w_lin, b_lin, *, compute_dtype=None):
    """Hoist per-call weight transposes: store params pre-transposed (in, out).

    Call once at init; pass the result to zero_control_block on every forward.
    Set compute_dtype=jnp.bfloat16 to run the GEMMs on the bf16 MXU path
    (expect ~1e-2 relative tolerance vs the f32 reference in that case).
    """
    wa_t = jnp.asarray(w_ada).T          # (S, 2C)
    ba = jnp.asarray(b_ada)              # (2C,)
    wl_t = jnp.asarray(w_lin).T          # (C, C)
    bl = jnp.asarray(b_lin)              # (C,)
    if compute_dtype is not None:
        wa_t = wa_t.astype(compute_dtype)
        wl_t = wl_t.astype(compute_dtype)
    return wa_t, ba, wl_t, bl


@functools.partial(jax.jit, static_argnames=("tn",))
def zero_control_block(h, cond, wa_t, b_ada, wl_t, b_lin, *, tn=512):
    """h: (B, N, C), cond: (B, S); weights pre-transposed by prepare_params."""
    B, N, C = h.shape

    # --- adaLN branch: once per call, batched GEMM (never enters kernel VMEM) ---
    c32 = cond.astype(jnp.float32)
    c32 = c32 * jax.nn.sigmoid(c32)                                   # SiLU
    ada = jnp.dot(c32.astype(wa_t.dtype), wa_t,
                  preferred_element_type=jnp.float32)
    ada = ada + b_ada.astype(jnp.float32)                             # (B, 2C)
    shift = ada[:, :C]                                                # (B, C)
    scale1 = 1.0 + ada[:, C:]                                         # (B, C), 1+scale hoisted

    # --- lane-dense folding for small channel counts (unmasked vst) ---
    if C < 128 and 128 % C == 0 and N % (128 // C) == 0:
        G = 128 // C
        C_eff, N_eff = 128, N // G
        h_k = h.reshape(B, N_eff, C_eff)                  # contiguous -> free reshape
        shift_k = jnp.tile(shift, (1, G))                 # (B, 128)
        scale1_k = jnp.tile(scale1, (1, G))               # (B, 128)
        wl_k = jnp.kron(jnp.eye(G, dtype=wl_t.dtype), wl_t)   # (128, 128) block-diag
        bl_k = jnp.tile(b_lin, (G,))                      # (128,)
    else:
        # TODO(synk): C not lane-alignable (C >= 128 non-multiple, or N % G != 0)
        # falls back to the direct path with masked stores on the last dim.
        C_eff, N_eff = C, N
        h_k, shift_k, scale1_k, wl_k, bl_k = h, shift, scale1, wl_t, b_lin

    ada_rows = jnp.concatenate([shift_k, scale1_k], axis=-1).reshape(B, 1, 2 * C_eff)
    bl_k = bl_k.reshape(1, C_eff)

    # --- tile the (folded) token axis ---
    TN = min(tn, N_eff)                       # tn multiple of 256; else TN == N_eff
    grid = (pl.cdiv(N_eff, TN), B)            # big axis first -> megacore shards it

    h_item = jnp.dtype(h.dtype).itemsize
    w_item = jnp.dtype(wl_k.dtype).itemsize
    tile = TN * C_eff
    vmem_bytes = (4 * tile * h_item            # h-in + out tiles, double buffered
                  + 3 * tile * 4               # in-kernel f32 temps (h, mod, out)
                  + C_eff * C_eff * w_item     # w_lin, single buffered (whole array)
                  + 8 * C_eff * 4)             # ada rows (2 bufs) + bias
    # Explicit scoped limit with headroom, capped at 48 MiB so it is v7x-safe.
    vmem_limit = min(int(1.5 * vmem_bytes) + (8 << 20), 48 << 20)

    cost = pl.CostEstimate(
        flops=2 * B * N_eff * C_eff * C_eff + 2 * B * N * C,
        transcendentals=0,
        bytes_accessed=(2 * B * N * C * h_item          # h in + out
                        + C_eff * C_eff * w_item        # w_lin
                        + 2 * B * C_eff * 4 + C_eff * 4),
    )

    out = pl.pallas_call(
        _zero_control_kernel,
        out_shape=jax.ShapeDtypeStruct((B, N_eff, C_eff), h.dtype),
        grid=grid,
        in_specs=[
            pl.BlockSpec((None, 1, 2 * C_eff), lambda n, b: (b, 0, 0)),   # ada row
            pl.BlockSpec((None, TN, C_eff), lambda n, b: (b, n, 0)),      # h tile
            pl.BlockSpec(memory_space=pltpu.MemorySpace.VMEM),            # w_lin^T (single buffer)
            pl.BlockSpec(memory_space=pltpu.MemorySpace.VMEM),            # b_lin   (single buffer)
        ],
        out_specs=pl.BlockSpec((None, TN, C_eff), lambda n, b: (b, n, 0)),
        compiler_params=pltpu.CompilerParams(
            dimension_semantics=("parallel", "parallel"),
            vmem_limit_bytes=vmem_limit,
        ),
        cost_estimate=cost,
    )(ada_rows, h_k, wl_k, bl_k)

    return out.reshape(B, N, C)


def zero_control_block_ref(h, cond, w_ada, b_ada, w_lin, b_lin):
    """Pure-JAX reference matching the PyTorch module."""
    c = cond * jax.nn.sigmoid(cond)
    ada = c @ w_ada.T + b_ada                 # (B, 2C)
    C = h.shape[-1]
    shift, scale = ada[:, :C], ada[:, C:]
    mod = h * (1 + scale[:, None, :]) + shift[:, None, :]
    return mod @ w_lin.T + b_lin


if __name__ == "__main__":
    # Small shapes: batch=2, tokens N=8, channels=16, cond_size=32.
    B, N, C, S = 2, 8, 16, 32
    init_std = 0.01

    key = jax.random.PRNGKey(0)
    k_h, k_cond, k_wa, k_wl = jax.random.split(key, 4)

    h = jax.random.normal(k_h, (B, N, C), dtype=jnp.float32)
    cond = jax.random.normal(k_cond, (B, S), dtype=jnp.float32)

    # zero_init=False branch (normal(std=0.01) weights, zero biases) so the
    # output is nontrivial; zero_init=True would make everything zero.
    w_ada = init_std * jax.random.normal(k_wa, (2 * C, S), dtype=jnp.float32)
    b_ada = jnp.zeros((2 * C,), dtype=jnp.float32)
    w_lin = init_std * jax.random.normal(k_wl, (C, C), dtype=jnp.float32)
    b_lin = jnp.zeros((C,), dtype=jnp.float32)

    # Weight transposes done once here (not inside every forward call).
    # For production, pass compute_dtype=jnp.bfloat16 for the bf16 MXU path.
    params = prepare_params(w_ada, b_ada, w_lin, b_lin)

    # Lane-dense (folded C<128) path.
    out = jax.block_until_ready(zero_control_block(h, cond, *params))
    ref = zero_control_block_ref(h, cond, w_ada, b_ada, w_lin, b_lin)
    assert out.shape == (B, N, C)
    assert jnp.allclose(out, ref, atol=1e-3, rtol=1e-3), (
        f"max abs err = {jnp.max(jnp.abs(out - ref))}")

    # Also exercise the generic (C >= 128, unfolded) path once.
    C2, N2 = 128, 24
    k2 = jax.random.PRNGKey(1)
    k_h2, k_c2, k_wa2, k_wl2 = jax.random.split(k2, 4)
    h2 = jax.random.normal(k_h2, (B, N2, C2), dtype=jnp.float32)
    cond2 = jax.random.normal(k_c2, (B, S), dtype=jnp.float32)
    w_ada2 = init_std * jax.random.normal(k_wa2, (2 * C2, S), dtype=jnp.float32)
    b_ada2 = jnp.zeros((2 * C2,), dtype=jnp.float32)
    w_lin2 = init_std * jax.random.normal(k_wl2, (C2, C2), dtype=jnp.float32)
    b_lin2 = jnp.zeros((C2,), dtype=jnp.float32)
    params2 = prepare_params(w_ada2, b_ada2, w_lin2, b_lin2)

    out2 = jax.block_until_ready(zero_control_block(h2, cond2, *params2))
    ref2 = zero_control_block_ref(h2, cond2, w_ada2, b_ada2, w_lin2, b_lin2)
    assert out2.shape == (B, N2, C2)
    assert jnp.allclose(out2, ref2, atol=1e-3, rtol=1e-3), (
        f"max abs err = {jnp.max(jnp.abs(out2 - ref2))}")

    print("KERNEL_OK")
</pallas_src>

<mosaic_0001>
module attributes {stable_mosaic.version = 11 : i64} {
  func.func @_zero_control_kernel(%arg0: i32, %arg1: i32, %arg2: memref<1x1x256xf32, #tpu.memory_space<vmem>>, %arg3: memref<1x1x128xf32, #tpu.memory_space<vmem>>, %arg4: memref<128x128xf32, #tpu.memory_space<vmem>>, %arg5: memref<1x128xf32, #tpu.memory_space<vmem>>, %arg6: memref<1x1x128xf32, #tpu.memory_space<vmem>>) attributes {dimension_semantics = [#tpu.dimension_semantics<parallel>, #tpu.dimension_semantics<parallel>], iteration_bounds = array<i64: 1, 2>, scalar_prefetch = 0 : i64, scratch_operands = 0 : i64, tpu.core_type = #tpu.core_type<tc>, window_params = [{transform_indices = @transform_0, window_bounds = array<i64: 1, 1, 256>}, {transform_indices = @transform_1, window_bounds = array<i64: 1, 1, 128>}, {pipeline_mode = #tpu.pipeline_mode<synchronous>, transform_indices = @transform_2, window_bounds = array<i64: 128, 128>}, {pipeline_mode = #tpu.pipeline_mode<synchronous>, transform_indices = @transform_3, window_bounds = array<i64: 1, 128>}, {transform_indices = @transform_4, window_bounds = array<i64: 1, 1, 128>}]} {
    %c0 = arith.constant 0 : index
    %c0_0 = arith.constant 0 : index
    %c0_1 = arith.constant 0 : index
    %0 = vector.load %arg2[%c0, %c0_0, %c0_1] : memref<1x1x256xf32, #tpu.memory_space<vmem>>, vector<1x1x256xf32>
    %1 = vector.shape_cast %0 : vector<1x1x256xf32> to vector<1x256xf32>
    %2 = vector.extract_strided_slice %1 {offsets = [0, 0], sizes = [1, 128], strides = [1, 1]} : vector<1x256xf32> to vector<1x128xf32>
    %3 = vector.extract_strided_slice %1 {offsets = [0, 128], sizes = [1, 128], strides = [1, 1]} : vector<1x256xf32> to vector<1x128xf32>
    %c0_2 = arith.constant 0 : index
    %c0_3 = arith.constant 0 : index
    %c0_4 = arith.constant 0 : index
    %4 = vector.load %arg3[%c0_2, %c0_3, %c0_4] : memref<1x1x128xf32, #tpu.memory_space<vmem>>, vector<1x1x128xf32>
    %5 = vector.shape_cast %4 : vector<1x1x128xf32> to vector<1x128xf32>
    %6 = arith.mulf %5, %3 : vector<1x128xf32>
    %7 = arith.addf %6, %2 : vector<1x128xf32>
    %c0_5 = arith.constant 0 : index
    %c0_6 = arith.constant 0 : index
    %8 = vector.load %arg4[%c0_5, %c0_6] : memref<128x128xf32, #tpu.memory_space<vmem>>, vector<128x128xf32>
    %cst = arith.constant dense<0.000000e+00> : vector<1x128xf32>
    %9 = tpu.matmul %7, %8, %cst {dimension_numbers = #tpu.dot_dimension_numbers<[1], [0], [0], [1], [0, 0, 1, 1], [], []>} : vector<1x128xf32>, vector<128x128xf32>, vector<1x128xf32> -> vector<1x128xf32>
    %c0_7 = arith.constant 0 : index
    %c0_8 = arith.constant 0 : index
    %10 = vector.load %arg5[%c0_7, %c0_8] : memref<1x128xf32, #tpu.memory_space<vmem>>, vector<1x128xf32>
    %11 = arith.addf %9, %10 : vector<1x128xf32>
    %c0_9 = arith.constant 0 : index
    %c0_10 = arith.constant 0 : index
    %c0_11 = arith.constant 0 : index
    %12 = vector.load %arg6[%c0_9, %c0_10, %c0_11] : memref<1x1x128xf32, #tpu.memory_space<vmem>>, vector<1x1x128xf32>
    %13 = vector.shape_cast %12 : vector<1x1x128xf32> to vector<1x128xf32>
    %14 = vector.shape_cast %11 : vector<1x128xf32> to vector<1x1x128xf32>
    tpu.vector_store %arg6[%c0_9, %c0_10, %c0_11], %14 {strides = array<i32>} : memref<1x1x128xf32, #tpu.memory_space<vmem>>, vector<1x1x128xf32>,
    return
  }
  func.func @transform_0(%arg0: i32, %arg1: i32) -> (i32, i32, i32) {
    %c0_i32 = arith.constant 0 : i32
    %c0_i32_0 = arith.constant 0 : i32
    %c0_i32_1 = arith.constant 0 : i32
    return %arg1, %c0_i32, %c0_i32_0 : i32, i32, i32
  }
  func.func @transform_1(%arg0: i32, %arg1: i32) -> (i32, i32, i32) {
    %c0_i32 = arith.constant 0 : i32
    %c0_i32_0 = arith.constant 0 : i32
    return %arg1, %arg0, %c0_i32 : i32, i32, i32
  }
  func.func @transform_2(%arg0: i32, %arg1: i32) -> (i32, i32) {
    %c0_i32 = arith.constant 0 : i32
    %c0_i32_0 = arith.constant 0 : i32
    %c0_i32_1 = arith.constant 0 : i32
    return %c0_i32, %c0_i32_0 : i32, i32
  }
  func.func @transform_3(%arg0: i32, %arg1: i32) -> (i32, i32) {
    %c0_i32 = arith.constant 0 : i32
    %c0_i32_0 = arith.constant 0 : i32
    %c0_i32_1 = arith.constant 0 : i32
    return %c0_i32, %c0_i32_0 : i32, i32
  }
  func.func @transform_4(%arg0: i32, %arg1: i32) -> (i32, i32, i32) {
    %c0_i32 = arith.constant 0 : i32
    %c0_i32_0 = arith.constant 0 : i32
    return %arg1, %arg0, %c0_i32 : i32, i32, i32
  }
}

</mosaic_0001>

<bundles_post_ra>
// kernel: tile.19
= control target key start
LH: loop header
LB: loop body
LE: loop exit
PB: predicated region body
PF: predicated region fallthrough
CT: control target
= control target key end

     0   :  { %s7_s6 = smov 3  ;;  %s21_s9 = smov 3  ;;  %vm4_vm0 = vcmask 130048   ;;  %vm11_vm1 = vcmask 1048448   ;;  %vm18_vm2 = vcmask 917248   ;;  %vm25_vm3 = vcmask 786048   ;;  %s119_s0 = inlined_call_operand.vmem [shape: f32[2,8,16], index: 0, kind: input, shape index: {}]   ;;  %s120_s1 = inlined_call_operand.vmem [shape: f32[2,128], index: 1, kind: output, shape index: {}]  }
   0x1   :  { %v61_v0 = vld [vmem:[%s119_s0 + $0x7] ss:$8 sm:%s7_s6]   ;;  %s75_s10 = smov 112   ;;  %v63_v1 = vld [vmem:[%s119_s0 + $0x5] ss:$8 sm:%s21_s9]   ;;  %s76_s13 = smov 80  }
   0x2   :  { %9 = vrot.lane.b32.xlu0 %v61_v0, %s75_s10  ;;  %23 = vrot.lane.b32.xlu1 %v63_v1, %s76_s13  ;;  %s14_s14 = smov 3  ;;  %s28_s15 = smov 3  ;;  %vm32_vm4 = vcmask 654848   ;;  %vm39_vm5 = vcmask 523648   ;;  %vm46_vm6 = vcmask 392448   ;;  %vm53_vm7 = vcmask 261248  }
   0x3   :  { %s35_s16 = smov 3  ;;  %v62_v3 = vld [vmem:[%s119_s0 + $0x6] ss:$8 sm:%s14_s14]   ;;  %s77_s21 = smov 48   ;;  %v64_v4 = vld [vmem:[%s119_s0 + $0x4] ss:$8 sm:%s28_s15]  }
   0x4   :  { %v65_v2 = vld [vmem:[%s119_s0 + $0x3] ss:$8 sm:%s35_s16]   ;;  %s42_s24 = smov 3  ;;  %s78_s25 = smov 96  }
   0x5   :  { %37 = vrot.lane.b32.xlu2 %v65_v2, %s77_s21  ;;  %s79_s26 = smov 64   ;;  %s49_s27 = smov 3  ;;  %v66_v5 = vld [vmem:[%s119_s0 + $0x2] ss:$8 sm:%s42_s24]  }
   0x6   :  { %v67_v6 = vld [vmem:[%s119_s0 + $0x1] ss:$8 sm:%s49_s27]   ;;  %s80_s3 = smov 32   ;;  %s81_s4 = smov 16  }
   0x7   :  { %s2_s5 = smov 3 }
   0x8   :  { %v3_v7 = vld [vmem:[%s119_s0] ss:$8 sm:%s2_s5]  }
   0x9   :  { %5 = vst.msk [vmem:[#allocation0] sm:$0x3] %vm4_vm0, %v3_v7  }
   0xa   :  { %16 = vrot.lane.b32.xlu0 %v62_v3, %s78_s25  ;;  %30 = vrot.lane.b32.xlu1 %v64_v4, %s79_s26 }
   0xd   :  { %44 = vrot.lane.b32.xlu2 %v66_v5, %s80_s3 }
  0x12   :  { %51 = vrot.lane.b32.xlu0 %v67_v6, %s81_s4 }
  0x5f   :  { %v38_v8 = vpop.permute.xlu2 %37  }
  0x67   :  { %v45_v9 = vpop.permute.xlu2 %44  }
  0x74   :  { %v10_v10 = vpop.permute.xlu0 %9   ;;  %v24_v11 = vpop.permute.xlu1 %23  }
  0x75   :  { %12 = vst.msk [vmem:[#allocation0] sm:$0x3] %vm11_vm1, %v10_v10  }
  0x7c   :  { %v17_v12 = vpop.permute.xlu0 %16   ;;  %v31_v13 = vpop.permute.xlu1 %30  }
  0x7d   :  { %19 = vst.msk [vmem:[#allocation0] sm:$0x3] %vm18_vm2, %v17_v12  }
  0x7e   :  { %26 = vst.msk [vmem:[#allocation0] sm:$0x3] %vm25_vm3, %v24_v11  }
  0x7f   :  { %33 = vst.msk [vmem:[#allocation0] sm:$0x3] %vm32_vm4, %v31_v13  }
  0x80   :  { %40 = vst.msk [vmem:[#allocation0] sm:$0x3] %vm39_vm5, %v38_v8  }
  0x81   :  { %47 = vst.msk [vmem:[#allocation0] sm:$0x3] %vm46_vm6, %v45_v9  }
  0x84   :  { %v52_v14 = vpop.permute.xlu0 %51  }
  0x85   :  { %54 = vst.msk [vmem:[#allocation0] sm:$0x3] %vm53_vm7, %v52_v14  }
  0x8c   :  { %v57_v15 = vld [vmem:[#allocation0] sm:$0x3] }
  0x8d   :  { %60 = vst [vmem:[%s120_s1] sm:$0x3] %v57_v15 }

// kernel: tile.28
= control target key start
LH: loop header
LB: loop body
LE: loop exit
PB: predicated region body
PF: predicated region fallthrough
CT: control target
= control target key end

     0   :  { %s22_s0 = inlined_call_operand.vmem [shape: f32[16], index: 0, kind: input, shape index: {}]   ;;  %s23_s1 = inlined_call_operand.vmem [shape: f32[8,16], index: 1, kind: output, shape index: {}]  }
   0x1   :  { %v4_v0 = vld [vmem:[%s22_s0] ss:$0 sm:$0xff] }
   0x2   :  { %5 = vst [vmem:[%s23_s1] sm:$0xff] %v4_v0 }

// kernel: tile.29
= control target key start
LH: loop header
LB: loop body
LE: loop exit
PB: predicated region body
PF: predicated region fallthrough
CT: control target
= control target key end

     0   :  { %s67_s10 = smov 112   ;;  %s68_s11 = smov 80   ;;  %vm3_vm0 = vcmask 130048   ;;  %vm9_vm1 = vcmask 1048448   ;;  %vm15_vm2 = vcmask 917248   ;;  %vm21_vm3 = vcmask 786048   ;;  %s111_s0 = inlined_call_operand.vmem [shape: f32[8,16], index: 0, kind: input, shape index: {}]   ;;  %s112_s1 = inlined_call_operand.vmem [shape: f32[1,128], index: 1, kind: output, shape index: {}]  }
   0x1   :  { %v53_v0 = vld [vmem:[%s111_s0 + $0x7] sm:$0x1]   ;;  %v55_v1 = vld [vmem:[%s111_s0 + $0x5] sm:$0x1]   ;;  %v57_v2 = vld [vmem:[%s111_s0 + $0x3] sm:$0x1]  }
   0x2   :  { %7 = vrot.lane.b32.xlu0 %v53_v0, %s67_s10  ;;  %19 = vrot.lane.b32.xlu1 %v55_v1, %s68_s11  ;;  %s69_s14 = smov 48   ;;  %v54_v3 = vld [vmem:[%s111_s0 + $0x6] sm:$0x1]   ;;  %v56_v4 = vld [vmem:[%s111_s0 + $0x4] sm:$0x1]   ;;  %s70_s21 = smov 96  }
   0x3   :  { %31 = vrot.lane.b32.xlu2 %v57_v2, %s69_s14  ;;  %v58_v5 = vld [vmem:[%s111_s0 + $0x2] sm:$0x1]   ;;  %s71_s22 = smov 64   ;;  %s72_s23 = smov 32   ;;  %v59_v6 = vld [vmem:[%s111_s0 + $0x1] sm:$0x1]  }
   0x4   :  { %s73_s26 = smov 16   ;;  %v2_v7 = vld [vmem:[%s111_s0] sm:$0x1]   ;;  %vm27_vm4 = vcmask 654848   ;;  %vm33_vm5 = vcmask 523648   ;;  %vm39_vm6 = vcmask 392448  }
   0x5   :  { %4 = vst.msk [vmem:[#allocation0] sm:$0x1] %vm3_vm0, %v2_v7   ;;  %vm45_vm7 = vcmask 261248  }
   0xa   :  { %13 = vrot.lane.b32.xlu0 %v54_v3, %s70_s21  ;;  %25 = vrot.lane.b32.xlu1 %v56_v4, %s71_s22 }
   0xb   :  { %37 = vrot.lane.b32.xlu2 %v58_v5, %s72_s23 }
  0x12   :  { %43 = vrot.lane.b32.xlu0 %v59_v6, %s73_s26 }
  0x5d   :  { %v32_v8 = vpop.permute.xlu2 %31  }
  0x65   :  { %v38_v9 = vpop.permute.xlu2 %37  }
  0x74   :  { %v8_v10 = vpop.permute.xlu0 %7   ;;  %v20_v11 = vpop.permute.xlu1 %19  }
  0x75   :  { %10 = vst.msk [vmem:[#allocation0] sm:$0x1] %vm9_vm1, %v8_v10  }
  0x7c   :  { %v14_v12 = vpop.permute.xlu0 %13   ;;  %v26_v13 = vpop.permute.xlu1 %25  }
  0x7d   :  { %16 = vst.msk [vmem:[#allocation0] sm:$0x1] %vm15_vm2, %v14_v12  }
  0x7e   :  { %22 = vst.msk [vmem:[#allocation0] sm:$0x1] %vm21_vm3, %v20_v11  }
  0x7f   :  { %28 = vst.msk [vmem:[#allocation0] sm:$0x1] %vm27_vm4, %v26_v13  }
  0x80   :  { %34 = vst.msk [vmem:[#allocation0] sm:$0x1] %vm33_vm5, %v32_v8  }
  0x81   :  { %40 = vst.msk [vmem:[#allocation0] sm:$0x1] %vm39_vm6, %v38_v9  }
  0x84   :  { %v44_v14 = vpop.permute.xlu0 %43  }
  0x85   :  { %46 = vst.msk [vmem:[#allocation0] sm:$0x1] %vm45_vm7, %v44_v14  }
  0x8c   :  { %v49_v15 = vld [vmem:[#allocation0] sm:$0x1] }
  0x8d   :  { %52 = vst [vmem:[%s112_s1] sm:$0x1] %v49_v15 }

// kernel: zero_control_block.1
= control target key start
LH: loop header
LB: loop body
LE: loop exit
PB: predicated region body
PF: predicated region fallthrough
CT: control target
= control target key end

     0   :  { %s439_s15 = smov 0   ;;  %s441_s16 = smov 0   ;;  %s531_s0 = inlined_call_operand.vmem [shape: f32[2,1,256], index: 0, kind: input, shape index: {}]   ;;  %s532_s1 = inlined_call_operand.vmem [shape: f32[2,1,128], index: 1, kind: input, shape index: {}]   ;;  %s533_s2 = inlined_call_operand.vmem [shape: f32[128,128], index: 2, kind: input, shape index: {}]   ;;  %s534_s3 = inlined_call_operand.vmem [shape: f32[1,128], index: 3, kind: input, shape index: {}]   ;;  %s535_s4 = inlined_call_operand.vmem [shape: f32[2,1,128], index: 4, kind: output, shape index: {}]  }
   0x1   :  { %s443_s17 = smov 0  }
   0x2 LB: > { %s23_s18 = sadd.s32 1, %s408_s16  ;;  %p362_p0 = scmp.ge.s32.totalorder %s412_s17, 1  ;;  %s412_s17 = sphi %s443_s17, %s14_s17   ;;  %s408_s16 = sphi %s441_s16, %s537_s16   ;;  %s404_s15 = sphi %s439_s15, %s536_s15  }
   0x3   : > { %p24_p1 = scmp.ge.s32.totalorder %s23_s18, 2  ;;  %p188_p2 = scmp.lt.s32.totalorder %s412_s17, 3 }
   0x5   : > { %s539_s18 = smov (%p24_p1, %s23_s18), 0  ;;  %p189_p3 = pnand %p362_p0, %p188_p2 }
   0x6   : > { %p220_p4 = scmp.lt.s32.totalorder (!%p189_p3), %s404_s15, 1 }
   0x7   : > { %192 = sbr.rel (%p189_p3) target bundleno = 173 (0xad), region = 36 }
   0xc   : > { %v258_v0 = vld [vmem:[%s533_s2 + $0x78] sm:$0xff]  ;;  %v257_v1 = vld [vmem:[%s533_s2 + $0x70] sm:$0xff]  ;;  %v256_v2 = vld [vmem:[%s533_s2 + $0x68] sm:$0xff]  ;;  %s541_s15 = smov (!%p220_p4, %s404_s15), 1 }
   0xd   : > { %260 = vmatpush.msra.mxu0 %v258_v0  ;;  %v255_v3 = vld [vmem:[%s533_s2 + $0x60] sm:$0xff]  ;;  %v254_v4 = vld [vmem:[%s533_s2 + $0x58] sm:$0xff]  ;;  %v253_v5 = vld [vmem:[%s533_s2 + $0x50] sm:$0xff]  ;;  %s363_s7 = sshll.u32 %s541_s15, 1  ;;  %s229_s25 = scalar_lea.vmem %s532_s1, %s541_s15 }
   0xe   : > { %v252_v6 = vld [vmem:[%s533_s2 + $0x48] sm:$0xff]  ;;  %v251_v7 = vld [vmem:[%s533_s2 + $0x40] sm:$0xff]  ;;  %v250_v8 = vld [vmem:[%s533_s2 + $0x38] sm:$0xff]  ;;  %s223_s14 = scalar_lea.vmem %s531_s0, %s363_s7 }
   0xf   : > { %261 = vmatpush.msra.mxu0 %v257_v1  ;;  %v249_v9 = vld [vmem:[%s533_s2 + $0x30] sm:$0xff]  ;;  %v236_v10 = vld [vmem:[%s223_s14] sm:$0x3]  ;;  %v248_v11 = vld [vmem:[%s533_s2 + $0x28] sm:$0xff]  ;;  %s235_s14 = scalar_lea.vmem %s535_s4, %s541_s15 }
  0x10   : > { %v247_v12 = vld [vmem:[%s533_s2 + $0x20] sm:$0xff]  ;;  %v239_v13 = vrot.slane %v236_v10, 1  ;;  %v246_v15 = vld [vmem:[%s533_s2 + $0x18] sm:$0xff]  ;;  %v245_v16 = vld [vmem:[%s533_s2 + $0x10] sm:$0xff] }
  0x11   : > { %262 = vmatpush.msra.mxu0 %v256_v2  ;;  %v237_v14 = vld [vmem:[%s229_s25] sm:$0x1]  ;;  %v244_v18 = vld [vmem:[%s533_s2 + $0x8] sm:$0xff] }
  0x12   : > { %v241_v17 = vmul.f32 %v239_v13, %v237_v14  ;;  %v243_v19 = vld [vmem:[%s533_s2] sm:$0xff] }
  0x13   : > { %263 = vmatpush.msra.mxu0 %v255_v3  ;;  %v259_v21 = vld [vmem:[%s534_s3] sm:$0x1] }
  0x14   : > { %v242_v20 = vadd.f32 %v241_v17, %v236_v10 }
  0x15   : > { %264 = vmatpush.msra.mxu0 %v254_v4 }
  0x17   : > { %265 = vmatpush.msra.mxu0 %v253_v5 }
  0x19   : > { %266 = vmatpush.msra.mxu0 %v252_v6 }
  0x1b   : > { %267 = vmatpush.msra.mxu0 %v251_v7 }
  0x1d   : > { %268 = vmatpush.msra.mxu0 %v250_v8 }
  0x1f   : > { %269 = vmatpush.msra.mxu0 %v249_v9 }
  0x21   : > { %270 = vmatpush.msra.mxu0 %v248_v11 }
  0x23   : > { %271 = vmatpush.msra.mxu0 %v247_v12 }
  0x25   : > { %272 = vmatpush.msra.mxu0 %v246_v15 }
  0x27   : > { %273 = vmatpush.msra.mxu0 %v245_v16 }
  0x29   : > { %274 = vmatpush.msra.mxu0 %v244_v18 }
  0x2b   : > { %275 = vmatpush.msra.mxu0 %v243_v19 }
  0x2c   : > { %276 = vmatmul.f32.vlgmr.msra.gmra.mxu0 %v242_v20 }
  0xa9   : > { %v277_v22 = vpop.f32.mrf.mxu0 }
  0xaa   : > { %v278_v23 = vadd.f32 %v277_v22, %v259_v21 }
  0xac   : > { %280 = vst [vmem:[%s235_s14] sm:$0x1] %v278_v23 }
  0xad PF: > { %s14_s17 = sadd.s32 1, %s412_s17   ;;  %s536_s15 = smov %s408_s16 }
  0xae   : > { %p11_p5 = scmp.ge.s32.totalorder %s14_s17, 4   ;;  %s537_s16 = smov %s539_s18 }
  0xb0   :  { %13 = sbr.rel (!%p11_p5) target bundleno = 2 (0x2), region = 69 }

</bundles_post_ra>
